<compile_context>
chip_gen: v7x
topology: tpu7x:2x2x1
jax: 0.10.0
libtpu: 0.0.40
codegen_flags: <defaults>
</compile_context>

<pallas_src>
import jax
import jax.numpy as jnp
from jax.experimental import pallas as pl
from jax.experimental.pallas import tpu as pltpu


# ---------------------------------------------------------------------------
# Pallas kernel: works on (D, TB) lane-major tiles of pooled embeddings.
# ---------------------------------------------------------------------------
def _match_kernel(cp_ref, r_ref, wt_ref, b_ref, out_ref):
    # cp_ref/r_ref: (D, TB) f32    wt_ref: (D, D) f32 (= W^T)
    # b_ref: (D, 1) f32            out_ref: (1, TB) f32 (lane-dense)
    ctx = jnp.tanh(
        jnp.dot(wt_ref[...], cp_ref[...],
                preferred_element_type=jnp.float32)   # MXU, f32 x f32 -> f32
        + b_ref[...]                                  # (D, 1) broadcast over lanes
    )                                                 # (D, TB) f32
    # Per-example dot product = sublane reduce -> already lane-dense (1, TB).
    out_ref[...] = jnp.sum(ctx * r_ref[...], axis=0, keepdims=True)


def _choose_tiling(B, max_tb=2048):
    """Pad batch to a 128-multiple and pick big tiles (<= 2 tiles when possible)."""
    b128 = ((B + 127) // 128) * 128
    if b128 <= 256:
        return b128, b128                 # tiny batch: one 128/256-wide tile
    if b128 <= 2 * max_tb:
        b_pad = ((b128 + 255) // 256) * 256
        return b_pad, b_pad // 2          # exactly 2 big tiles (v7x 2-TC split)
    b_pad = ((b128 + 2 * max_tb - 1) // (2 * max_tb)) * (2 * max_tb)
    return b_pad, max_tb                  # huge batch: even count of 2048 tiles


def persona_match_forward(cp_t, r_t, W, b):
    """cp_t, r_t: (D, B) f32 pooled (transposed) embeddings -> logits (B,) f32."""
    D, B = cp_t.shape
    b_pad, tb = _choose_tiling(B)
    n_tiles = b_pad // tb

    def pad(x):
        return jnp.pad(x, ((0, 0), (0, b_pad - B)))

    cp_p, r_p = pad(cp_t), pad(r_t)
    w_t = W.T.astype(jnp.float32)                  # (D, D)
    b_col = b.reshape(D, 1).astype(jnp.float32)    # (D, 1)

    out = pl.pallas_call(
        _match_kernel,
        out_shape=jax.ShapeDtypeStruct((1, b_pad), jnp.float32),
        grid=(n_tiles,),
        in_specs=[
            pl.BlockSpec((D, tb), lambda i: (0, i)),   # u+p pooled tile
            pl.BlockSpec((D, tb), lambda i: (0, i)),   # r pooled tile
            pl.BlockSpec((D, D), lambda i: (0, 0)),    # W^T (resident)
            pl.BlockSpec((D, 1), lambda i: (0, 0)),    # bias (resident)
        ],
        out_specs=pl.BlockSpec((1, tb), lambda i: (0, i)),
        compiler_params=pltpu.CompilerParams(
            dimension_semantics=("parallel",),         # batch tiles across TCs
        ),
    )(cp_p, r_p, w_t, b_col)
    return out[0, :B]


# ---------------------------------------------------------------------------
# XLA-side glue: embedding gather + mean pool (linear -> safe to pre-pool),
# emitted directly in the transposed (D, B) layout the kernel consumes.
# ---------------------------------------------------------------------------
def _mean_pool_embed_t(E, tok):
    """E: (V, D) f32, tok: (B, L) int32 -> (D, B) f32 mean-pooled, transposed."""
    emb = jnp.take(E, tok, axis=0)                 # (B, L, D)
    return jnp.mean(emb, axis=1).T                 # fold 1/L here, not in kernel


def forward(batch_u, batch_r, batch_p, params):
    E, W, b = params["embedding"], params["W"], params["b"]
    B = batch_u.shape[0]
    u_t = _mean_pool_embed_t(E, batch_u.reshape(B, -1))   # (D, B)
    p_t = _mean_pool_embed_t(E, batch_p.reshape(B, -1))   # (D, B)
    r_t = _mean_pool_embed_t(E, batch_r.reshape(B, -1))   # (D, B)
    cp_t = u_t + p_t                                      # pre-add, fuses with pooling
    return persona_match_forward(cp_t, r_t, W, b)


def init_params(key, vocab=100, hidden=32):
    k1, k2, k3 = jax.random.split(key, 3)
    return {
        "embedding": jax.random.normal(k1, (vocab, hidden), jnp.float32) * 0.1,
        "W": jax.random.normal(k2, (hidden, hidden), jnp.float32) * 0.1,
        "b": jax.random.normal(k3, (1, hidden), jnp.float32) * 0.1,
    }


if __name__ == "__main__":
    # TODO(synk): the training loop / AdamW / CrossEntropyLoss / file-based
    # metrics of the base class have no Pallas equivalent and are not reproduced.
    key = jax.random.PRNGKey(0)
    k_u, k_r, k_p, k_params = jax.random.split(key, 4)

    B, num_utt, num_persona, seq, vocab, hidden = 2, 4, 3, 8, 100, 32
    batch_u = jax.random.randint(k_u, (B, num_utt, seq), 0, vocab, jnp.int32)
    batch_r = jax.random.randint(k_r, (B, seq), 0, vocab, jnp.int32)
    batch_p = jax.random.randint(k_p, (B, num_persona, seq), 0, vocab, jnp.int32)

    params = init_params(k_params, vocab=vocab, hidden=hidden)

    logits = jax.jit(forward)(batch_u, batch_r, batch_p, params)
    jax.block_until_ready(logits)
    assert logits.shape == (B,) and logits.dtype == jnp.float32
    print("KERNEL_OK")
</pallas_src>

<mosaic_0001>
module attributes {stable_mosaic.version = 11 : i64} {
  func.func @_match_kernel(%arg0: i32, %arg1: memref<32x128xf32, #tpu.memory_space<vmem>>, %arg2: memref<32x128xf32, #tpu.memory_space<vmem>>, %arg3: memref<32x32xf32, #tpu.memory_space<vmem>>, %arg4: memref<32x1xf32, #tpu.memory_space<vmem>>, %arg5: memref<1x128xf32, #tpu.memory_space<vmem>>) attributes {dimension_semantics = [#tpu.dimension_semantics<parallel>], iteration_bounds = array<i64: 1>, scalar_prefetch = 0 : i64, scratch_operands = 0 : i64, tpu.core_type = #tpu.core_type<tc>, window_params = [{transform_indices = @transform_0, window_bounds = array<i64: 32, 128>}, {transform_indices = @transform_1, window_bounds = array<i64: 32, 128>}, {pipeline_mode = #tpu.pipeline_mode<synchronous>, transform_indices = @transform_2, window_bounds = array<i64: 32, 32>}, {pipeline_mode = #tpu.pipeline_mode<synchronous>, transform_indices = @transform_3, window_bounds = array<i64: 32, 1>}, {transform_indices = @transform_4, window_bounds = array<i64: 1, 128>}]} {
    %c0 = arith.constant 0 : index
    %c0_0 = arith.constant 0 : index
    %0 = vector.load %arg3[%c0, %c0_0] : memref<32x32xf32, #tpu.memory_space<vmem>>, vector<32x32xf32>
    %c0_1 = arith.constant 0 : index
    %c0_2 = arith.constant 0 : index
    %1 = vector.load %arg1[%c0_1, %c0_2] : memref<32x128xf32, #tpu.memory_space<vmem>>, vector<32x128xf32>
    %cst = arith.constant dense<0.000000e+00> : vector<32x128xf32>
    %2 = tpu.matmul %0, %1, %cst {dimension_numbers = #tpu.dot_dimension_numbers<[1], [0], [0], [1], [0, 0, 1, 1], [], []>} : vector<32x32xf32>, vector<32x128xf32>, vector<32x128xf32> -> vector<32x128xf32>
    %c0_3 = arith.constant 0 : index
    %c0_4 = arith.constant 0 : index
    %3 = vector.load %arg4[%c0_3, %c0_4] : memref<32x1xf32, #tpu.memory_space<vmem>>, vector<32x1xf32>
    %4 = vector.broadcast %3 : vector<32x1xf32> to vector<32x128xf32>
    %5 = arith.addf %2, %4 : vector<32x128xf32>
    %6 = math.tanh %5 : vector<32x128xf32>
    %c0_5 = arith.constant 0 : index
    %c0_6 = arith.constant 0 : index
    %7 = vector.load %arg2[%c0_5, %c0_6] : memref<32x128xf32, #tpu.memory_space<vmem>>, vector<32x128xf32>
    %8 = arith.mulf %6, %7 : vector<32x128xf32>
    %cst_7 = arith.constant dense<0.000000e+00> : vector<128xf32>
    %9 = vector.multi_reduction <add>, %8, %cst_7 [0] : vector<32x128xf32> to vector<128xf32>
    %10 = vector.shape_cast %9 : vector<128xf32> to vector<1x128xf32>
    %c0_8 = arith.constant 0 : index
    %c0_9 = arith.constant 0 : index
    %11 = vector.load %arg5[%c0_8, %c0_9] : memref<1x128xf32, #tpu.memory_space<vmem>>, vector<1x128xf32>
    tpu.vector_store %arg5[%c0_8, %c0_9], %10 {strides = array<i32>} : memref<1x128xf32, #tpu.memory_space<vmem>>, vector<1x128xf32>,
    return
  }
  func.func @transform_0(%arg0: i32) -> (i32, i32) {
    %c0_i32 = arith.constant 0 : i32
    %c0_i32_0 = arith.constant 0 : i32
    return %c0_i32, %arg0 : i32, i32
  }
  func.func @transform_1(%arg0: i32) -> (i32, i32) {
    %c0_i32 = arith.constant 0 : i32
    %c0_i32_0 = arith.constant 0 : i32
    return %c0_i32, %arg0 : i32, i32
  }
  func.func @transform_2(%arg0: i32) -> (i32, i32) {
    %c0_i32 = arith.constant 0 : i32
    %c0_i32_0 = arith.constant 0 : i32
    %c0_i32_1 = arith.constant 0 : i32
    return %c0_i32, %c0_i32_0 : i32, i32
  }
  func.func @transform_3(%arg0: i32) -> (i32, i32) {
    %c0_i32 = arith.constant 0 : i32
    %c0_i32_0 = arith.constant 0 : i32
    %c0_i32_1 = arith.constant 0 : i32
    return %c0_i32, %c0_i32_0 : i32, i32
  }
  func.func @transform_4(%arg0: i32) -> (i32, i32) {
    %c0_i32 = arith.constant 0 : i32
    %c0_i32_0 = arith.constant 0 : i32
    return %c0_i32, %arg0 : i32, i32
  }
}

</mosaic_0001>

<bundles_post_ra>
// kernel: forward.1
= control target key start
LH: loop header
LB: loop body
LE: loop exit
PB: predicated region body
PF: predicated region fallthrough
CT: control target
= control target key end

     0   :  { %vm49_vm0 = vcmask 261120   ;;  %v222_v3 = vmov 0   ;;  %s303_s0 = inlined_call_operand.vmem [shape: f32[32,128], index: 0, kind: input, shape index: {}]   ;;  %s304_s2 = inlined_call_operand.vmem [shape: f32[32,32], index: 2, kind: input, shape index: {}]   ;;  %s305_s3 = inlined_call_operand.vmem [shape: f32[32,1], index: 3, kind: input, shape index: {}]   ;;  %s306_s1 = inlined_call_operand.vmem [shape: f32[32,128], index: 1, kind: input, shape index: {}]   ;;  %s307_s4 = inlined_call_operand.vmem [shape: f32[1,128], index: 4, kind: output, shape index: {}]  }
   0x1   :  { %v21_v0 = vld [vmem:[%s303_s0] sm:$0xff]  ;;  %v22_v1 = vld [vmem:[%s303_s0 + $0x8] sm:$0xff]  ;;  %v23_v2 = vld [vmem:[%s303_s0 + $0x10] sm:$0xff]  ;;  %212 = vset.pattern.permute.xlu0 %v222_v3  ;;  %213 = vset.pattern.permute.xlu1 %v222_v3 }
   0x2   :  { %v199_v4 = vpack.c.bf16 %v22_v1, %v21_v0  ;;  %v24_v5 = vld [vmem:[%s303_s0 + $0x18] sm:$0xff]  ;;  %v17_v6 = vld [vmem:[%s304_s2] sm:$0xff]  ;;  %v19_v7 = vld [vmem:[%s304_s2 + $0x10] sm:$0xff] }
   0x3   :  { %v203_v8 = vpack.c.bf16 %v24_v5, %v23_v2  ;;  %193 = vmatprep.mubr.msk.f32.mxu0 %vm49_vm0, %v17_v6  ;;  %196 = vmatprep.mubr.msk.f32.mxu1 %vm49_vm0, %v19_v7  ;;  %v25_v9 = vld [vmem:[%s305_s3] sm:$0xff]  ;;  %v27_v10 = vld [vmem:[%s305_s3 + $0x10] sm:$0xff]  ;;  %v26_v11 = vld [vmem:[%s305_s3 + $0x8] sm:$0xff] }
   0x4   :  { %200 = vmatprep.subr.bf16.mxu0 %v199_v4  ;;  %207 = vmatprep.subr.bf16.mxu1 %v199_v4  ;;  %v28_v12 = vld [vmem:[%s305_s3 + $0x18] sm:$0xff]  ;;  %v18_v13 = vld [vmem:[%s304_s2 + $0x8] sm:$0xff]  ;;  %v151_v29 = vld [vmem:[%s306_s1] sm:$0xff] }
   0x5   :  { %202 = vmatpush3.bf16.msra.mxu0 %v199_v4  ;;  %209 = vmatpush3.bf16.msra.mxu1 %v199_v4  ;;  %v20_v14 = vld [vmem:[%s304_s2 + $0x18] sm:$0xff]  ;;  %v152_v27 = vld [vmem:[%s306_s1 + $0x8] sm:$0xff]  ;;  %v153_v32 = vld [vmem:[%s306_s1 + $0x10] sm:$0xff] }
   0x6   :  { %204 = vmatprep.subr.bf16.mxu0 %v203_v8  ;;  %208 = vmatprep.subr.bf16.mxu1 %v203_v8  ;;  %v154_v36 = vld [vmem:[%s306_s1 + $0x18] sm:$0xff] }
   0x7   :  { %31 = vperm.xlu0 %212, %v25_v9   ;;  %41 = vperm.xlu1 %213, %v27_v10  }
   0x9   :  { %206 = vmatpush3.bf16.msra.mxu0 %v203_v8  ;;  %210 = vmatpush3.bf16.msra.mxu1 %v203_v8 }
   0xb   :  { %36 = vperm.xlu0 %212, %v26_v11   ;;  %46 = vperm.xlu1 %213, %v28_v12  }
   0xc   :  { %194 = vmatmul.mubr.msk.f32.vlgmr.msra.gmra.mrb[0].mxu0 %vm49_vm0, %v18_v13  ;;  %197 = vmatmul.mubr.msk.f32.vlgmr.msra.gmra.mrb[0].mxu1 %vm49_vm0, %v20_v14 }
  0x86   :  { %v32_v15 = vpop.permute.xlu0 %31  ;;  %v42_v16 = vpop.permute.xlu1 %41 }
  0x8a   :  { %v37_v17 = vpop.permute.xlu0 %36  ;;  %v47_v18 = vpop.permute.xlu1 %46 }
  0xdf   :  { %v195_v19 = vpop.f32.mrb[0].mxu0  ;;  %v198_v20 = vpop.f32.mrb[0].mxu1 }
  0xe0   :  { %v134_v21 = vadd.f32 %v195_v19, %v37_v17  ;;  %v128_v22 = vpop.f32.mrb[1].mxu0  ;;  %v138_v23 = vpop.f32.mrb[1].mxu1  ;;  %v144_v26 = vadd.f32 %v198_v20, %v47_v18 }
  0xe1   :  { %v129_v24 = vadd.f32 %v128_v22, %v32_v15  ;;  %v139_v25 = vadd.f32 %v138_v23, %v42_v16 }
  0xe2   :  { %214 = vtanh.f32 %v134_v21 }
  0xe3   :  { %216 = vtanh.f32 %v129_v24 }
  0xe4   :  { %218 = vtanh.f32 %v139_v25 }
  0xe5   :  { %220 = vtanh.f32 %v144_v26 }
  0xec   :  { %v215_v28 = vpop.eup %214 }
  0xed   :  { %v156_v30 = vmul.f32 %v215_v28, %v152_v27  ;;  %v217_v31 = vpop.eup %216 }
  0xee   :  { %v219_v33 = vpop.eup %218  ;;  %v155_v34 = vmul.f32 %v217_v31, %v151_v29 }
  0xef   :  { %v221_v35 = vpop.eup %220  ;;  %v157_v38 = vmul.f32 %v219_v33, %v153_v32 }
  0xf0   :  { %v159_v37 = vadd.f32 %v156_v30, %v155_v34  ;;  %v158_v39 = vmul.f32 %v221_v35, %v154_v36 }
  0xf2   :  { %v160_v40 = vadd.f32 %v159_v37, %v157_v38 }
  0xf4   :  { %v161_v41 = vadd.f32 %v160_v40, %v158_v39 }
  0xf6   :  { %v162_v42 = vrot.slane %v161_v41, 4 }
  0xf8   :  { %v163_v43 = vadd.f32 %v162_v42, %v161_v41 }
  0xfa   :  { %v164_v44 = vrot.slane %v163_v43, 2 }
  0xfc   :  { %v165_v45 = vadd.f32 %v164_v44, %v163_v43 }
  0xfe   :  { %v166_v46 = vrot.slane %v165_v45, 1 }
 0x100   :  { %v167_v47 = vadd.f32 %v166_v46, %v165_v45 }
 0x102   :  { %168 = vst [vmem:[%s307_s4] sm:$0x1] %v167_v47 }

</bundles_post_ra>
